<compile_context>
chip_gen: v7x
topology: tpu7x:2x2x1
jax: 0.10.0
libtpu: 0.0.40
codegen_flags: <defaults>
</compile_context>

<pallas_src>
import functools
import math

import jax
import jax.numpy as jnp
from jax import lax
from jax.experimental import pallas as pl
from jax.experimental.pallas import tpu as pltpu


def _bert_self_attention_kernel(
    x_ref,    # (1, tq, H)  hidden rows for this query tile (Q projection source)
    k_ref,    # (1, L, H)   pre-projected keys   (projection hoisted to XLA)
    v_ref,    # (1, L, H)   pre-projected values (projection hoisted to XLA)
    m_ref,    # (1, 1, L)   additive attention mask
    wq_ref,   # (H, H)      query weight, pre-transposed [H_in, H_out], scale folded in
    bq_ref,   # (1, H)      query bias (f32), scale folded in
    o_ref,    # (1, tq, H)  context-layer output tile
    acc_scr,  # VMEM (tq, H) f32 staging buffer for the single lane-dense store
    *,
    num_heads: int,
    head_dim: int,
):
    acts_dtype = x_ref.dtype

    # Full-width Q projection on the MXU (1/sqrt(dh) already folded into wq/bq).
    q = jnp.dot(x_ref[0], wq_ref[...], preferred_element_type=jnp.float32) + bq_ref[...]
    q = q.astype(acts_dtype)                                 # (tq, H)

    add_mask = m_ref[0].astype(jnp.float32)                  # (1, L), broadcasts over rows

    # Per-head attention.  num_heads is a compile-time constant; the unrolled loop writes
    # each head's context into the staging scratch immediately (bounded live ranges, no
    # deferred concatenate) while keeping full LLO scheduling visibility.
    for h in range(num_heads):
        sl = slice(h * head_dim, (h + 1) * head_dim)         # static lane slice
        q_h = q[:, sl]                                       # (tq, dh)
        k_h = k_ref[0, :, sl]                                # (L, dh)
        v_h = v_ref[0, :, sl]                                # (L, dh)

        # scores = Q_h @ K_h^T : contract the head dim directly, no transposed tile.
        scores = lax.dot_general(
            q_h, k_h, (((1,), (1,)), ((), ())),
            preferred_element_type=jnp.float32,
        )                                                    # (tq, L); scale pre-folded
        scores = scores + add_mask

        # Row-wise softmax with deferred normalization: scale the (tq, dh) context by the
        # approximate reciprocal of the denominator instead of the (tq, L) probabilities.
        scores = scores - jnp.max(scores, axis=-1, keepdims=True)
        e = jnp.exp(scores)
        inv_denom = pl.reciprocal(jnp.sum(e, axis=-1, keepdims=True), approx=True)
        ctx_h = jnp.dot(e.astype(acts_dtype), v_h,
                        preferred_element_type=jnp.float32)  # (tq, dh) f32
        acc_scr[:, sl] = ctx_h * inv_denom

    # Single lane-dense (tq, H) store.
    o_ref[0] = acc_scr[...].astype(o_ref.dtype)


def bert_self_attention(hidden, attn_mask, wq, bq, wk, bk, wv, bv, *, num_heads,
                        q_tile=None, compute_dtype=jnp.bfloat16):
    """hidden: [B, L, H]; attn_mask: [B, L] additive mask (0 / -1e4).
    Weights follow nn.Linear convention W: [H_out, H_in], bias: [H]."""
    B, L, H = hidden.shape
    assert H % num_heads == 0, "hidden size must be a multiple of num_heads"
    head_dim = H // num_heads
    out_dtype = hidden.dtype

    if q_tile is None:
        q_tile = L if L <= 512 else 512
    assert L % q_tile == 0
    num_q_tiles = L // q_tile

    f32 = jnp.float32
    scale = 1.0 / math.sqrt(head_dim)

    x = hidden.astype(compute_dtype)

    # Pre-transpose the Q weight ONCE ([H_out, H_in] -> [H_in, H_out]) and fold the
    # 1/sqrt(head_dim) softmax scale into it (and the bias) before the compute-dtype cast.
    wq_t = (wq.astype(f32).T * scale).astype(compute_dtype)
    bq_s = (bq.astype(f32) * scale).reshape(1, H)

    # K/V projections hoisted out of the kernel: one full-width XLA GEMM each.  This frees
    # the kernel of the qi==0 carry (both grid axes become "parallel") and of the full-x
    # block + two (L, H) scratches of VMEM residency.
    k = (jnp.einsum("blh,oh->blo", x, wk.astype(compute_dtype),
                    preferred_element_type=f32) + bk.astype(f32)).astype(compute_dtype)
    v = (jnp.einsum("blh,oh->blo", x, wv.astype(compute_dtype),
                    preferred_element_type=f32) + bv.astype(f32)).astype(compute_dtype)

    mask3 = attn_mask.astype(f32).reshape(B, 1, L)

    kernel = functools.partial(
        _bert_self_attention_kernel, num_heads=num_heads, head_dim=head_dim)

    itemsize = jnp.dtype(compute_dtype).itemsize
    cost = pl.CostEstimate(
        flops=int(2 * B * L * H * H + 4 * B * num_heads * L * L * head_dim),
        transcendentals=int(B * num_heads * L * L),
        bytes_accessed=int(
            3 * B * L * H * itemsize                      # hidden, K, V
            + B * L * 4                                   # mask (f32)
            + H * H * itemsize + H * 4                    # Wq^T, bq
            + B * L * H * jnp.dtype(out_dtype).itemsize), # output
    )

    return pl.pallas_call(
        kernel,
        out_shape=jax.ShapeDtypeStruct((B, L, H), out_dtype),
        grid_spec=pltpu.PrefetchScalarGridSpec(
            num_scalar_prefetch=0,
            grid=(B, num_q_tiles),
            in_specs=[
                pl.BlockSpec((1, q_tile, H), lambda b, qi: (b, qi, 0)),  # hidden (Q rows)
                pl.BlockSpec((1, L, H), lambda b, qi: (b, 0, 0)),        # K (pre-projected)
                pl.BlockSpec((1, L, H), lambda b, qi: (b, 0, 0)),        # V (pre-projected)
                pl.BlockSpec((1, 1, L), lambda b, qi: (b, 0, 0)),        # additive mask
                pl.BlockSpec((H, H), lambda b, qi: (0, 0)),              # Wq^T (scaled)
                pl.BlockSpec((1, H), lambda b, qi: (0, 0)),              # bq (scaled, f32)
            ],
            out_specs=pl.BlockSpec((1, q_tile, H), lambda b, qi: (b, qi, 0)),
            scratch_shapes=[pltpu.VMEM((q_tile, H), jnp.float32)],
        ),
        compiler_params=pltpu.CompilerParams(
            dimension_semantics=("parallel", "parallel"),
            vmem_limit_bytes=64 * 1024 * 1024,
        ),
        cost_estimate=cost,
    )(x, k, v, mask3, wq_t, bq_s)


def bert_self_attention_ref(hidden, attn_mask, wq, bq, wk, bk, wv, bv, *, num_heads):
    """Pure-JAX reference replicating the PyTorch forward exactly (eval mode)."""
    B, L, H = hidden.shape
    dh = H // num_heads
    q = jnp.einsum("blh,oh->blo", hidden, wq) + bq
    k = jnp.einsum("blh,oh->blo", hidden, wk) + bk
    v = jnp.einsum("blh,oh->blo", hidden, wv) + bv

    def split(t):
        return t.reshape(B, L, num_heads, dh).transpose(0, 2, 1, 3)

    qh, kh, vh = split(q), split(k), split(v)
    scores = jnp.einsum("bhqd,bhkd->bhqk", qh, kh) / math.sqrt(dh)
    scores = scores + attn_mask.astype(jnp.float32)[:, None, None, :]
    probs = jax.nn.softmax(scores, axis=-1)
    ctx = jnp.einsum("bhqk,bhkd->bhqd", probs, vh)
    return ctx.transpose(0, 2, 1, 3).reshape(B, L, H)


if __name__ == "__main__":
    B, L, H, NH = 2, 8, 32, 4   # small demo shapes; kernel generalizes to BERT scale

    key = jax.random.PRNGKey(0)
    k_x, k_wq, k_bq, k_wk, k_bk, k_wv, k_bv = jax.random.split(key, 7)

    hidden = jax.random.normal(k_x, (B, L, H), dtype=jnp.float32)

    bound = 1.0 / math.sqrt(H)

    def u(k, shape):
        return jax.random.uniform(k, shape, minval=-bound, maxval=bound, dtype=jnp.float32)

    wq, bq = u(k_wq, (H, H)), u(k_bq, (H,))
    wk, bk = u(k_wk, (H, H)), u(k_bk, (H,))
    wv, bv = u(k_wv, (H, H)), u(k_bv, (H,))

    # BERT-style additive mask: 0 for attended positions, -10000 for masked positions.
    attn_mask = jnp.zeros((B, L), dtype=jnp.float32).at[1, -2:].set(-10000.0)

    ref = bert_self_attention_ref(hidden, attn_mask, wq, bq, wk, bk, wv, bv, num_heads=NH)

    # f32 compute path: tight parity check (tolerance covers the EUP approx reciprocal).
    out_f32 = bert_self_attention(hidden, attn_mask, wq, bq, wk, bk, wv, bv,
                                  num_heads=NH, compute_dtype=jnp.float32)
    out_f32 = jax.block_until_ready(out_f32)
    assert jnp.allclose(out_f32, ref, atol=5e-3, rtol=5e-3), "f32 mismatch vs reference"

    # bf16 compute path (default, MXU-native): looser tolerance for bf16 rounding.
    out_bf16 = bert_self_attention(hidden, attn_mask, wq, bq, wk, bk, wv, bv, num_heads=NH)
    out_bf16 = jax.block_until_ready(out_bf16)
    assert jnp.allclose(out_bf16, ref, atol=5e-2, rtol=5e-2), "bf16 mismatch vs reference"

    print("KERNEL_OK")
</pallas_src>

<mosaic_0001>
module attributes {stable_mosaic.version = 11 : i64} {
  func.func @_bert_self_attention_kernel(%arg0: i32, %arg1: i32, %arg2: memref<1x8x32xf32, #tpu.memory_space<vmem>>, %arg3: memref<1x8x32xf32, #tpu.memory_space<vmem>>, %arg4: memref<1x8x32xf32, #tpu.memory_space<vmem>>, %arg5: memref<1x1x8xf32, #tpu.memory_space<vmem>>, %arg6: memref<32x32xf32, #tpu.memory_space<vmem>>, %arg7: memref<1x32xf32, #tpu.memory_space<vmem>>, %arg8: memref<1x8x32xf32, #tpu.memory_space<vmem>>, %arg9: memref<8x32xf32, #tpu.memory_space<vmem>>) attributes {dimension_semantics = [#tpu.dimension_semantics<parallel>, #tpu.dimension_semantics<parallel>], iteration_bounds = array<i64: 2, 1>, scalar_prefetch = 0 : i64, scratch_operands = 1 : i64, tpu.core_type = #tpu.core_type<tc>, window_params = [{transform_indices = @transform_0, window_bounds = array<i64: 1, 8, 32>}, {transform_indices = @transform_1, window_bounds = array<i64: 1, 8, 32>}, {transform_indices = @transform_2, window_bounds = array<i64: 1, 8, 32>}, {transform_indices = @transform_3, window_bounds = array<i64: 1, 1, 8>}, {pipeline_mode = #tpu.pipeline_mode<synchronous>, transform_indices = @transform_4, window_bounds = array<i64: 32, 32>}, {pipeline_mode = #tpu.pipeline_mode<synchronous>, transform_indices = @transform_5, window_bounds = array<i64: 1, 32>}, {transform_indices = @transform_6, window_bounds = array<i64: 1, 8, 32>}]} {
    %c0 = arith.constant 0 : index
    %c0_0 = arith.constant 0 : index
    %c0_1 = arith.constant 0 : index
    %0 = vector.load %arg2[%c0, %c0_0, %c0_1] : memref<1x8x32xf32, #tpu.memory_space<vmem>>, vector<1x8x32xf32>
    %1 = vector.shape_cast %0 : vector<1x8x32xf32> to vector<8x32xf32>
    %c0_2 = arith.constant 0 : index
    %c0_3 = arith.constant 0 : index
    %2 = vector.load %arg6[%c0_2, %c0_3] : memref<32x32xf32, #tpu.memory_space<vmem>>, vector<32x32xf32>
    %cst = arith.constant dense<0.000000e+00> : vector<8x32xf32>
    %3 = tpu.matmul %1, %2, %cst {dimension_numbers = #tpu.dot_dimension_numbers<[1], [0], [0], [1], [0, 0, 1, 1], [], []>} : vector<8x32xf32>, vector<32x32xf32>, vector<8x32xf32> -> vector<8x32xf32>
    %c0_4 = arith.constant 0 : index
    %c0_5 = arith.constant 0 : index
    %4 = vector.load %arg7[%c0_4, %c0_5] : memref<1x32xf32, #tpu.memory_space<vmem>>, vector<1x32xf32>
    %5 = vector.broadcast %4 : vector<1x32xf32> to vector<8x32xf32>
    %6 = arith.addf %3, %5 : vector<8x32xf32>
    %c0_6 = arith.constant 0 : index
    %c0_7 = arith.constant 0 : index
    %c0_8 = arith.constant 0 : index
    %7 = vector.load %arg5[%c0_6, %c0_7, %c0_8] : memref<1x1x8xf32, #tpu.memory_space<vmem>>, vector<1x1x8xf32>
    %8 = vector.shape_cast %7 : vector<1x1x8xf32> to vector<1x8xf32>
    %9 = vector.extract_strided_slice %6 {offsets = [0, 0], sizes = [8, 8], strides = [1, 1]} : vector<8x32xf32> to vector<8x8xf32>
    %c0_9 = arith.constant 0 : index
    %c0_10 = arith.constant 0 : index
    %c0_11 = arith.constant 0 : index
    %10 = vector.load %arg3[%c0_9, %c0_10, %c0_11] : memref<1x8x32xf32, #tpu.memory_space<vmem>>, vector<1x8x8xf32>
    %11 = vector.shape_cast %10 : vector<1x8x8xf32> to vector<8x8xf32>
    %c0_12 = arith.constant 0 : index
    %c0_13 = arith.constant 0 : index
    %c0_14 = arith.constant 0 : index
    %12 = vector.load %arg4[%c0_12, %c0_13, %c0_14] : memref<1x8x32xf32, #tpu.memory_space<vmem>>, vector<1x8x8xf32>
    %13 = vector.shape_cast %12 : vector<1x8x8xf32> to vector<8x8xf32>
    %cst_15 = arith.constant dense<0.000000e+00> : vector<8x8xf32>
    %14 = tpu.matmul %9, %11, %cst_15 {dimension_numbers = #tpu.dot_dimension_numbers<[1], [1], [0], [0], [0, 0, 1, 0], [], []>} : vector<8x8xf32>, vector<8x8xf32>, vector<8x8xf32> -> vector<8x8xf32>
    %15 = vector.broadcast %8 : vector<1x8xf32> to vector<8x8xf32>
    %16 = arith.addf %14, %15 : vector<8x8xf32>
    %cst_16 = arith.constant dense<0xFF800000> : vector<8xf32>
    %17 = vector.multi_reduction <maximumf>, %16, %cst_16 [1] : vector<8x8xf32> to vector<8xf32>
    %18 = vector.shape_cast %17 : vector<8xf32> to vector<8x1xf32>
    %19 = vector.broadcast %18 : vector<8x1xf32> to vector<8x8xf32>
    %20 = arith.subf %16, %19 : vector<8x8xf32>
    %21 = math.exp %20 : vector<8x8xf32>
    %cst_17 = arith.constant dense<0.000000e+00> : vector<8xf32>
    %22 = vector.multi_reduction <add>, %21, %cst_17 [1] : vector<8x8xf32> to vector<8xf32>
    %23 = vector.shape_cast %22 : vector<8xf32> to vector<8x1xf32>
    %24 = tpu.reciprocal %23 {approx = true} : vector<8x1xf32> -> vector<8x1xf32>
    %cst_18 = arith.constant dense<0.000000e+00> : vector<8x8xf32>
    %25 = tpu.matmul %21, %13, %cst_18 {dimension_numbers = #tpu.dot_dimension_numbers<[1], [0], [0], [1], [0, 0, 1, 1], [], []>} : vector<8x8xf32>, vector<8x8xf32>, vector<8x8xf32> -> vector<8x8xf32>
    %26 = vector.broadcast %24 : vector<8x1xf32> to vector<8x8xf32>
    %27 = arith.mulf %25, %26 : vector<8x8xf32>
    %c0_19 = arith.constant 0 : index
    %c0_20 = arith.constant 0 : index
    %28 = vector.load %arg9[%c0_19, %c0_20] : memref<8x32xf32, #tpu.memory_space<vmem>>, vector<8x8xf32>
    tpu.vector_store %arg9[%c0_19, %c0_20], %27 {strides = array<i32>} : memref<8x32xf32, #tpu.memory_space<vmem>>, vector<8x8xf32>,
    %29 = vector.extract_strided_slice %6 {offsets = [0, 8], sizes = [8, 8], strides = [1, 1]} : vector<8x32xf32> to vector<8x8xf32>
    %c0_21 = arith.constant 0 : index
    %c0_22 = arith.constant 0 : index
    %c8 = arith.constant 8 : index
    %30 = vector.load %arg3[%c0_21, %c0_22, %c8] : memref<1x8x32xf32, #tpu.memory_space<vmem>>, vector<1x8x8xf32>
    %31 = vector.shape_cast %30 : vector<1x8x8xf32> to vector<8x8xf32>
    %c0_23 = arith.constant 0 : index
    %c0_24 = arith.constant 0 : index
    %c8_25 = arith.constant 8 : index
    %32 = vector.load %arg4[%c0_23, %c0_24, %c8_25] : memref<1x8x32xf32, #tpu.memory_space<vmem>>, vector<1x8x8xf32>
    %33 = vector.shape_cast %32 : vector<1x8x8xf32> to vector<8x8xf32>
    %cst_26 = arith.constant dense<0.000000e+00> : vector<8x8xf32>
    %34 = tpu.matmul %29, %31, %cst_26 {dimension_numbers = #tpu.dot_dimension_numbers<[1], [1], [0], [0], [0, 0, 1, 0], [], []>} : vector<8x8xf32>, vector<8x8xf32>, vector<8x8xf32> -> vector<8x8xf32>
    %35 = vector.broadcast %8 : vector<1x8xf32> to vector<8x8xf32>
    %36 = arith.addf %34, %35 : vector<8x8xf32>
    %cst_27 = arith.constant dense<0xFF800000> : vector<8xf32>
    %37 = vector.multi_reduction <maximumf>, %36, %cst_27 [1] : vector<8x8xf32> to vector<8xf32>
    %38 = vector.shape_cast %37 : vector<8xf32> to vector<8x1xf32>
    %39 = vector.broadcast %38 : vector<8x1xf32> to vector<8x8xf32>
    %40 = arith.subf %36, %39 : vector<8x8xf32>
    %41 = math.exp %40 : vector<8x8xf32>
    %cst_28 = arith.constant dense<0.000000e+00> : vector<8xf32>
    %42 = vector.multi_reduction <add>, %41, %cst_28 [1] : vector<8x8xf32> to vector<8xf32>
    %43 = vector.shape_cast %42 : vector<8xf32> to vector<8x1xf32>
    %44 = tpu.reciprocal %43 {approx = true} : vector<8x1xf32> -> vector<8x1xf32>
    %cst_29 = arith.constant dense<0.000000e+00> : vector<8x8xf32>
    %45 = tpu.matmul %41, %33, %cst_29 {dimension_numbers = #tpu.dot_dimension_numbers<[1], [0], [0], [1], [0, 0, 1, 1], [], []>} : vector<8x8xf32>, vector<8x8xf32>, vector<8x8xf32> -> vector<8x8xf32>
    %46 = vector.broadcast %44 : vector<8x1xf32> to vector<8x8xf32>
    %47 = arith.mulf %45, %46 : vector<8x8xf32>
    %c0_30 = arith.constant 0 : index
    %c8_31 = arith.constant 8 : index
    %48 = vector.load %arg9[%c0_30, %c8_31] : memref<8x32xf32, #tpu.memory_space<vmem>>, vector<8x8xf32>
    tpu.vector_store %arg9[%c0_30, %c8_31], %47 {strides = array<i32>} : memref<8x32xf32, #tpu.memory_space<vmem>>, vector<8x8xf32>,
    %49 = vector.extract_strided_slice %6 {offsets = [0, 16], sizes = [8, 8], strides = [1, 1]} : vector<8x32xf32> to vector<8x8xf32>
    %c0_32 = arith.constant 0 : index
    %c0_33 = arith.constant 0 : index
    %c16 = arith.constant 16 : index
    %50 = vector.load %arg3[%c0_32, %c0_33, %c16] : memref<1x8x32xf32, #tpu.memory_space<vmem>>, vector<1x8x8xf32>
    %51 = vector.shape_cast %50 : vector<1x8x8xf32> to vector<8x8xf32>
    %c0_34 = arith.constant 0 : index
    %c0_35 = arith.constant 0 : index
    %c16_36 = arith.constant 16 : index
    %52 = vector.load %arg4[%c0_34, %c0_35, %c16_36] : memref<1x8x32xf32, #tpu.memory_space<vmem>>, vector<1x8x8xf32>
    %53 = vector.shape_cast %52 : vector<1x8x8xf32> to vector<8x8xf32>
    %cst_37 = arith.constant dense<0.000000e+00> : vector<8x8xf32>
    %54 = tpu.matmul %49, %51, %cst_37 {dimension_numbers = #tpu.dot_dimension_numbers<[1], [1], [0], [0], [0, 0, 1, 0], [], []>} : vector<8x8xf32>, vector<8x8xf32>, vector<8x8xf32> -> vector<8x8xf32>
    %55 = vector.broadcast %8 : vector<1x8xf32> to vector<8x8xf32>
    %56 = arith.addf %54, %55 : vector<8x8xf32>
    %cst_38 = arith.constant dense<0xFF800000> : vector<8xf32>
    %57 = vector.multi_reduction <maximumf>, %56, %cst_38 [1] : vector<8x8xf32> to vector<8xf32>
    %58 = vector.shape_cast %57 : vector<8xf32> to vector<8x1xf32>
    %59 = vector.broadcast %58 : vector<8x1xf32> to vector<8x8xf32>
    %60 = arith.subf %56, %59 : vector<8x8xf32>
    %61 = math.exp %60 : vector<8x8xf32>
    %cst_39 = arith.constant dense<0.000000e+00> : vector<8xf32>
    %62 = vector.multi_reduction <add>, %61, %cst_39 [1] : vector<8x8xf32> to vector<8xf32>
    %63 = vector.shape_cast %62 : vector<8xf32> to vector<8x1xf32>
    %64 = tpu.reciprocal %63 {approx = true} : vector<8x1xf32> -> vector<8x1xf32>
    %cst_40 = arith.constant dense<0.000000e+00> : vector<8x8xf32>
    %65 = tpu.matmul %61, %53, %cst_40 {dimension_numbers = #tpu.dot_dimension_numbers<[1], [0], [0], [1], [0, 0, 1, 1], [], []>} : vector<8x8xf32>, vector<8x8xf32>, vector<8x8xf32> -> vector<8x8xf32>
    %66 = vector.broadcast %64 : vector<8x1xf32> to vector<8x8xf32>
    %67 = arith.mulf %65, %66 : vector<8x8xf32>
    %c0_41 = arith.constant 0 : index
    %c16_42 = arith.constant 16 : index
    %68 = vector.load %arg9[%c0_41, %c16_42] : memref<8x32xf32, #tpu.memory_space<vmem>>, vector<8x8xf32>
    tpu.vector_store %arg9[%c0_41, %c16_42], %67 {strides = array<i32>} : memref<8x32xf32, #tpu.memory_space<vmem>>, vector<8x8xf32>,
    %69 = vector.extract_strided_slice %6 {offsets = [0, 24], sizes = [8, 8], strides = [1, 1]} : vector<8x32xf32> to vector<8x8xf32>
    %c0_43 = arith.constant 0 : index
    %c0_44 = arith.constant 0 : index
    %c24 = arith.constant 24 : index
    %70 = vector.load %arg3[%c0_43, %c0_44, %c24] : memref<1x8x32xf32, #tpu.memory_space<vmem>>, vector<1x8x8xf32>
    %71 = vector.shape_cast %70 : vector<1x8x8xf32> to vector<8x8xf32>
    %c0_45 = arith.constant 0 : index
    %c0_46 = arith.constant 0 : index
    %c24_47 = arith.constant 24 : index
    %72 = vector.load %arg4[%c0_45, %c0_46, %c24_47] : memref<1x8x32xf32, #tpu.memory_space<vmem>>, vector<1x8x8xf32>
    %73 = vector.shape_cast %72 : vector<1x8x8xf32> to vector<8x8xf32>
    %cst_48 = arith.constant dense<0.000000e+00> : vector<8x8xf32>
    %74 = tpu.matmul %69, %71, %cst_48 {dimension_numbers = #tpu.dot_dimension_numbers<[1], [1], [0], [0], [0, 0, 1, 0], [], []>} : vector<8x8xf32>, vector<8x8xf32>, vector<8x8xf32> -> vector<8x8xf32>
    %75 = vector.broadcast %8 : vector<1x8xf32> to vector<8x8xf32>
    %76 = arith.addf %74, %75 : vector<8x8xf32>
    %cst_49 = arith.constant dense<0xFF800000> : vector<8xf32>
    %77 = vector.multi_reduction <maximumf>, %76, %cst_49 [1] : vector<8x8xf32> to vector<8xf32>
    %78 = vector.shape_cast %77 : vector<8xf32> to vector<8x1xf32>
    %79 = vector.broadcast %78 : vector<8x1xf32> to vector<8x8xf32>
    %80 = arith.subf %76, %79 : vector<8x8xf32>
    %81 = math.exp %80 : vector<8x8xf32>
    %cst_50 = arith.constant dense<0.000000e+00> : vector<8xf32>
    %82 = vector.multi_reduction <add>, %81, %cst_50 [1] : vector<8x8xf32> to vector<8xf32>
    %83 = vector.shape_cast %82 : vector<8xf32> to vector<8x1xf32>
    %84 = tpu.reciprocal %83 {approx = true} : vector<8x1xf32> -> vector<8x1xf32>
    %cst_51 = arith.constant dense<0.000000e+00> : vector<8x8xf32>
    %85 = tpu.matmul %81, %73, %cst_51 {dimension_numbers = #tpu.dot_dimension_numbers<[1], [0], [0], [1], [0, 0, 1, 1], [], []>} : vector<8x8xf32>, vector<8x8xf32>, vector<8x8xf32> -> vector<8x8xf32>
    %86 = vector.broadcast %84 : vector<8x1xf32> to vector<8x8xf32>
    %87 = arith.mulf %85, %86 : vector<8x8xf32>
    %c0_52 = arith.constant 0 : index
    %c24_53 = arith.constant 24 : index
    %88 = vector.load %arg9[%c0_52, %c24_53] : memref<8x32xf32, #tpu.memory_space<vmem>>, vector<8x8xf32>
    tpu.vector_store %arg9[%c0_52, %c24_53], %87 {strides = array<i32>} : memref<8x32xf32, #tpu.memory_space<vmem>>, vector<8x8xf32>,
    %c0_54 = arith.constant 0 : index
    %c0_55 = arith.constant 0 : index
    %89 = vector.load %arg9[%c0_54, %c0_55] : memref<8x32xf32, #tpu.memory_space<vmem>>, vector<8x32xf32>
    %c0_56 = arith.constant 0 : index
    %c0_57 = arith.constant 0 : index
    %c0_58 = arith.constant 0 : index
    %90 = vector.load %arg8[%c0_56, %c0_57, %c0_58] : memref<1x8x32xf32, #tpu.memory_space<vmem>>, vector<1x8x32xf32>
    %91 = vector.shape_cast %90 : vector<1x8x32xf32> to vector<8x32xf32>
    %92 = vector.shape_cast %89 : vector<8x32xf32> to vector<1x8x32xf32>
    tpu.vector_store %arg8[%c0_56, %c0_57, %c0_58], %92 {strides = array<i32>} : memref<1x8x32xf32, #tpu.memory_space<vmem>>, vector<1x8x32xf32>,
    return
  }
  func.func @transform_0(%arg0: i32, %arg1: i32) -> (i32, i32, i32) {
    %c0_i32 = arith.constant 0 : i32
    %c0_i32_0 = arith.constant 0 : i32
    return %arg0, %arg1, %c0_i32 : i32, i32, i32
  }
  func.func @transform_1(%arg0: i32, %arg1: i32) -> (i32, i32, i32) {
    %c0_i32 = arith.constant 0 : i32
    %c0_i32_0 = arith.constant 0 : i32
    %c0_i32_1 = arith.constant 0 : i32
    return %arg0, %c0_i32, %c0_i32_0 : i32, i32, i32
  }
  func.func @transform_2(%arg0: i32, %arg1: i32) -> (i32, i32, i32) {
    %c0_i32 = arith.constant 0 : i32
    %c0_i32_0 = arith.constant 0 : i32
    %c0_i32_1 = arith.constant 0 : i32
    return %arg0, %c0_i32, %c0_i32_0 : i32, i32, i32
  }
  func.func @transform_3(%arg0: i32, %arg1: i32) -> (i32, i32, i32) {
    %c0_i32 = arith.constant 0 : i32
    %c0_i32_0 = arith.constant 0 : i32
    %c0_i32_1 = arith.constant 0 : i32
    return %arg0, %c0_i32, %c0_i32_0 : i32, i32, i32
  }
  func.func @transform_4(%arg0: i32, %arg1: i32) -> (i32, i32) {
    %c0_i32 = arith.constant 0 : i32
    %c0_i32_0 = arith.constant 0 : i32
    %c0_i32_1 = arith.constant 0 : i32
    return %c0_i32, %c0_i32_0 : i32, i32
  }
  func.func @transform_5(%arg0: i32, %arg1: i32) -> (i32, i32) {
    %c0_i32 = arith.constant 0 : i32
    %c0_i32_0 = arith.constant 0 : i32
    %c0_i32_1 = arith.constant 0 : i32
    return %c0_i32, %c0_i32_0 : i32, i32
  }
  func.func @transform_6(%arg0: i32, %arg1: i32) -> (i32, i32, i32) {
    %c0_i32 = arith.constant 0 : i32
    %c0_i32_0 = arith.constant 0 : i32
    return %arg0, %arg1, %c0_i32 : i32, i32, i32
  }
}

</mosaic_0001>

<bundles_post_ra>
// kernel: tpu_custom_call.1
= control target key start
LH: loop header
LB: loop body
LE: loop exit
PB: predicated region body
PF: predicated region fallthrough
CT: control target
= control target key end

     0   :  { %s2352_s0 = inlined_call_operand.hbm [shape: f32[2,8,32], index: 0, kind: input, shape index: {}]   ;;  %s2353_s1 = inlined_call_operand.hbm [shape: f32[2,8,32], index: 1, kind: input, shape index: {}]   ;;  %s2354_s2 = inlined_call_operand.hbm [shape: f32[2,8,32], index: 2, kind: input, shape index: {}]   ;;  %s2355_s3 = inlined_call_operand.hbm [shape: f32[2,1,8], index: 3, kind: input, shape index: {}]   ;;  %s2356_s4 = inlined_call_operand.hbm [shape: f32[32,32], index: 4, kind: input, shape index: {}]   ;;  %s2357_s5 = inlined_call_operand.hbm [shape: f32[1,32], index: 5, kind: input, shape index: {}]   ;;  %s2358_s6 = inlined_call_operand.hbm [shape: f32[2,8,32], index: 6, kind: output, shape index: {}]  }
   0x1   :  { %2375 = sst [smem:[#allocation26_spill]] %s2353_s1 }
   0x2   :  { %2376 = sst [smem:[#allocation27_spill]] %s2356_s4 }
   0x3   :  { %11 = vsyncpa [#allocation4], 0 }
   0x4   :  { %13 = vsyncpa [#allocation4 + $0x1], 0 }
   0x5   :  { %14 = vsyncpa [#allocation7], 0 }
   0x6   :  { %16 = vsyncpa [#allocation7 + $0x1], 0 }
   0x7   :  { %17 = vsyncpa [#allocation10], 0 }
   0x8   :  { %19 = vsyncpa [#allocation10 + $0x1], 0 }
   0x9   :  { %20 = vsyncpa [#allocation13], 0 }
   0xa   :  { %21 = vsyncpa [#allocation5], 0 }
   0xb   :  { %23 = vsyncpa [#allocation5 + $0x1], 0  ;;  %s1948_s21 = smov 0   ;;  %s1950_s22 = smov 0  }
   0xc   :  { %s1952_s23 = smov 0   ;;  %s1954_s24 = smov 0  }
   0xd   :  { %s1956_s25 = smov 0   ;;  %s1958_s26 = smov 0  }
   0xe LB: > { %2377 = sst [smem:[#allocation21_spill]] %s1873_s21  ;;  %s1979_s27 = sadd.s32 4294967295, %s1893_s26   ;;  %s1893_s26 = sphi %s1958_s26, %s29_s26   ;;  %s1889_s25 = sphi %s1956_s25, %s2417_s25   ;;  %s1885_s24 = sphi %s1954_s24, %s2416_s24   ;;  %s1881_s23 = sphi %s1952_s23, %s2412_s23   ;;  %s1877_s22 = sphi %s1950_s22, %s2415_s22   ;;  %s1873_s21 = sphi %s1948_s21, %s2414_s21  }
   0xf   : > { %2378 = sst [smem:[#allocation22_spill]] %s1881_s23  ;;  %s1378_s28 = sadd.s32 4294967294, %s1893_s26  }
  0x10   : > { %p63_p0 = scmp.ne.s32.totalorder %s1877_s22, %s1873_s21  ;;  %p2359_p1 = scmp.eq.s32.totalorder %s1979_s27, 0 }
  0x11   : > { %p215_p3 = scmp.eq.s32.totalorder %s1378_s28, 1  ;;  %p1379_p5 = scmp.ge.s32.totalorder %s1893_s26, 1 }
  0x12   : > { %p1988_p4 = por %p2359_p1, %p63_p0  ;;  %p222_p7 = scmp.lt.s32.totalorder %s1893_s26, 3 }
  0x13   : > { %p1993_p6 = por %p215_p3, %p63_p0  ;;  %s1895_s8 = smov [#allocation11]  }
  0x14   : > { %s2379_s29 = scalar_select %p1988_p4, 1, 0 }
  0x15   : > { %s2380_s30 = scalar_select %p1993_p6, 1, 0 }
  0x16   : > { %p1998_p8 = pnand %p1379_p5, %p222_p7  ;;  %s234_s9 = sshll.u32 %s1895_s8, 4  ;;  %s235_s9 = int_to_ptr.vmem [resolvable:$true] %s234_s9 }
  0x17   : > { %2381 = sst [smem:[#allocation23_spill]] %s2380_s30  ;;  %s41_s11 = sadd.s32 1, %s1889_s25 }
  0x18   : > { %s2382_s7 = scalar_select %p1998_p8, 1, 0 }
  0x19   : > { %p1512_p9 = pneg %p1998_p8  ;;  %s2384_s4 = sld [smem:[#allocation27_spill]] }
  0x1b   : > { %p2007_p11 = pnand %p1512_p9, %p2359_p1 }
  0x1d   : > { %s2383_s10 = scalar_select %p2007_p11, 1, 0 }
  0x1e   : > { %p2366_p13 = pneg %p2007_p11 }
  0x1f   : > { %s1619_s14 = scalar_lea.hbm %s2384_s4, 512 }
  0x20   : > { %p1620_p12 = scmp.ne.s32.totalorder %s2384_s4, %s1619_s14  ;;  %p1626_p5 = scmp.lt.u32.totalorder %s1619_s14, %s2384_s4 }
  0x22   : > { %p1622_p0 = pnand %p2366_p13, %p1620_p12 }
  0x24   : > { %p1623_p3 = pneg %p1622_p0 }
  0x26   : > { %p1628_p7 = pnand %p1626_p5, %p1623_p3 }
  0x28   : > { %1631 = shalt.err (!%p1628_p7)
}
  0x29   : > { %s1632_s19 = scalar_lea.vmem %s235_s9, 512  ;;  %p1640_p2 = scmp.lt.s32.totalorder %s235_s9, %s235_s9 }
  0x2a   : > { %p1633_p9 = scmp.ne.s32.totalorder %s235_s9, %s1632_s19  ;;  %p1641_p6 = scmp.lt.s32.totalorder %s1632_s19, %s1632_s19 }
  0x2c   : > { %p1635_p10 = pnand %p1633_p9, %p2366_p13  ;;  %p1642_p4 = por %p1641_p6, %p1640_p2 }
  0x2e   : > { %p1636_p1 = pneg %p1635_p10 }
  0x30   : > { %p1643_p8 = pnand %p1642_p4, %p1636_p1 }
  0x32   : > { %1646 = shalt.err (!%p1643_p8)
}
  0x33   : > { %s1896_s20 = smov 128   ;;  %s1897_s28 = smov 8  }
  0x34   : > { %1515 = dma.hbm_to_vmem [thread:$0]  (!%p2007_p11), %s2384_s4, 512, %s235_s9, [#allocation10], %s1896_s20, %s1896_s20, %s1897_s28  }
  0x35   : > { %p43_p1 = scmp.ge.s32.totalorder %s41_s11, 2  ;;  %s50_s13 = sadd.s32 1, %s1881_s23 }
  0x36   : > { %p57_p2 = scmp.ne.s32.totalorder %s1881_s23, %s1877_s22  ;;  %p58_p4 = scmp.eq.s32.totalorder %s1893_s26, 0 }
  0x37   : > { %s2419_s11 = smov (%p43_p1, %s41_s11), 0  ;;  %p2386_p8 = scmp.eq.s32.totalorder %s1979_s27, 1 }
  0x38   : > { %2385 = sst [smem:[#allocation24_spill]] %s2419_s11  ;;  %p59_p6 = por %p58_p4, %p57_p2 }
  0x39   : > { %p2042_p10 = por %p2386_p8, %p57_p2  ;;  %s45_s15 = ssub.s32 %s1889_s25, %s2419_s11 }
  0x3a   : > { %p1538_p12 = scmp.lt.s32.totalorder %s1893_s26, 2  ;;  %p48_p0 = scmp.eq.s32.totalorder %s45_s15, 0 }
  0x3b   : > { %s2387_s14 = scalar_select %p2042_p10, 1, 0 }
  0x3c   : > { %s2050_s16 = sand.u32 1, %s1881_s23   ;;  %s2056_s17 = sshll.u32 %s1889_s25, 7 }
  0x3d   : > { %s2053_s9 = sshll.u32 %s2050_s16, 3  ;;  %p2061_p3 = pnand %p1538_p12, %p59_p6 }
  0x3e   : > { %s2059_s18 = scalar_select %p48_p0, %s1881_s23, %s50_s13  }
  0x3f   : > { %s2389_s19 = scalar_select %p2061_p3, 1, 0 }
  0x40   : > { %2388 = sst [smem:[#allocation25_spill]] %s2059_s18  ;;  %s2365_s20 = sand.u32 1, %s1893_s26  }
  0x41   : > { %s2390_s1 = sld [smem:[#allocation26_spill]]  ;;  %s282_s15 = scalar_lea.vmem [#allocation6], %s2053_s9 }
  0x42   : > { %s289_s4 = sshll.u32 %s282_s15, 4  ;;  %s2077_s13 = scalar_lea.sflag [#allocation7], %s2365_s20  ;;  %s2073_s4 = int_to_ptr.vmem [resolvable:$true] %s289_s4 }
  0x43   : > { %p2083_p7 = pneg %p2061_p3 }
  0x45   : > { %s2391_s18 = scalar_select %p2083_p7, 1, 0 }
  0x47   : > { %s2070_s12 = scalar_lea.hbm %s2390_s1, %s2056_s17  ;;  %s1652_s15 = scalar_lea.hbm %s2390_s1, 256 }
  0x48   : > { %s1647_s11 = scalar_lea.hbm %s2070_s12, 128  ;;  %p1653_p2 = scmp.lt.u32.totalorder %s2070_s12, %s2390_s1 }
  0x49   : > { %p1648_p5 = scmp.ne.s32.totalorder %s2070_s12, %s1647_s11  ;;  %p1654_p4 = scmp.lt.u32.totalorder %s1652_s15, %s1647_s11 }
  0x4a   : > { %p1656_p8 = scmp.lt.u32.totalorder %s1647_s11, %s2070_s12 }
  0x4b   : > { %p1650_p9 = pnand %p2083_p7, %p1648_p5  ;;  %p1655_p6 = por %p1654_p4, %p1653_p2 }
  0x4d   : > { %p1651_p1 = pneg %p1650_p9  ;;  %p1657_p12 = por %p1656_p8, %p1655_p6 }
  0x4f   : > { %p1658_p0 = pnand %p1657_p12, %p1651_p1 }
  0x51   : > { %1661 = shalt.err (!%p1658_p0)
}
  0x52   : > { %s1662_s20 = scalar_lea.vmem %s2073_s4, 128  ;;  %s1898_s28 = smov [#allocation6]  }
  0x53   : > { %p1663_p5 = scmp.ne.s32.totalorder %s2073_s4, %s1662_s20  ;;  %s1667_s8 = sshll.u32 %s1898_s28, 4  ;;  %s1668_s8 = int_to_ptr.vmem [resolvable:$false] %s1667_s8 }
  0x54   : > { %s1669_s23 = scalar_lea.vmem %s1668_s8, 256  ;;  %p1670_p10 = scmp.lt.s32.totalorder %s2073_s4, %s1668_s8 }
  0x55   : > { %p1665_p9 = pnand %p1663_p5, %p2083_p7  ;;  %p1671_p11 = scmp.lt.s32.totalorder %s1669_s23, %s1662_s20 }
  0x57   : > { %p1666_p13 = pneg %p1665_p9  ;;  %p1672_p2 = por %p1671_p11, %p1670_p10 }
  0x59   : > { %p1673_p4 = pnand %p1672_p2, %p1666_p13 }
  0x5b   : > { %1676 = shalt.err (!%p1673_p4)
}
  0x5c   : > { %1525 = dma.hbm_to_vmem [thread:$0]  (!%p2061_p3), %s2070_s12, 128, %s2073_s4, %s2077_s13  }
  0x5d   : > { %s1899_s30 = smov [#allocation12]   ;;  %s1677_s28 = scalar_lea.hbm %s2357_s5, 16 }
  0x5e   : > { %s248_s11 = sshll.u32 %s1899_s30, 4  ;;  %p1678_p11 = scmp.ne.s32.totalorder %s2357_s5, %s1677_s28  ;;  %s249_s11 = int_to_ptr.vmem [resolvable:$true] %s248_s11 }
  0x5f   : > { %p2392_p13 = scmp.ne.s32.totalorder %s2383_s10, 0  ;;  %p1684_p8 = scmp.lt.u32.totalorder %s1677_s28, %s2357_s5 }
  0x61   : > { %p2393_p10 = pneg %p2392_p13 }
  0x63   : > { %p1680_p1 = pnand %p1678_p11, %p2393_p10 }
  0x65   : > { %p1681_p6 = pneg %p1680_p1 }
  0x67   : > { %p1686_p12 = pnand %p1684_p8, %p1681_p6 }
  0x69   : > { %1689 = shalt.err (!%p1686_p12)
}
  0x6a   : > { %s1690_s4 = scalar_lea.vmem %s249_s11, 16  ;;  %p2394_p5 = pmov %p2393_p10 }
  0x6b   : > { %p1691_p0 = scmp.ne.s32.totalorder %s249_s11, %s1690_s4  ;;  %s1697_s1 = scalar_lea.vmem %s249_s11, 32 }
  0x6c   : > { %p1698_p4 = scmp.lt.s32.totalorder %s249_s11, %s249_s11  ;;  %p1699_p3 = scmp.lt.s32.totalorder %s1697_s1, %s1690_s4 }
  0x6d   : > { %p1693_p9 = pnand %p1691_p0, %p2394_p5 }
  0x6e   : > { %p1700_p7 = por %p1699_p3, %p1698_p4 }
  0x6f   : > { %p1694_p2 = pneg %p1693_p9 }
  0x71   : > { %p1701_p10 = pnand %p1700_p7, %p1694_p2 }
  0x73   : > { %1704 = shalt.err (!%p1701_p10)
}
  0x74   : > { %1518 = dma.hbm_to_vmem [thread:$0]  (!%p2392_p13), %s2357_s5, 16, %s249_s11, [#allocation13]  }
  0x75   : > { %s2131_s28 = scalar_lea.hbm %s2352_s0, %s2056_s17  ;;  %s263_s8 = scalar_lea.vmem [#allocation3], %s2053_s9 }
  0x76   : > { %s271_s20 = sshll.u32 %s263_s8, 4  ;;  %s260_s10 = scalar_lea.sflag [#allocation4], %s2050_s16  ;;  %s272_s20 = int_to_ptr.vmem [resolvable:$true] %s271_s20 }
  0x77   : > { %s1705_s23 = scalar_lea.hbm %s2131_s28, 128  ;;  %p2395_p7 = scmp.ne.s32.totalorder %s2391_s18, 0 }
  0x78   : > { %p1706_p3 = scmp.ne.s32.totalorder %s2131_s28, %s1705_s23  ;;  %s1710_s1 = scalar_lea.hbm %s2352_s0, 256 }
  0x79   : > { %p1711_p13 = scmp.lt.u32.totalorder %s2131_s28, %s2352_s0  ;;  %p1712_p6 = scmp.lt.u32.totalorder %s1710_s1, %s1705_s23 }
  0x7a   : > { %p1708_p11 = pnand %p1706_p3, %p2395_p7  ;;  %p1714_p12 = scmp.lt.u32.totalorder %s1705_s23, %s2131_s28 }
  0x7b   : > { %p1713_p8 = por %p1712_p6, %p1711_p13 }
  0x7c   : > { %p1709_p1 = pneg %p1708_p11 }
  0x7d   : > { %p1715_p0 = por %p1714_p12, %p1713_p8 }
  0x7f   : > { %p1716_p5 = pnand %p1715_p0, %p1709_p1 }
  0x81   : > { %1719 = shalt.err (!%p1716_p5)
}
  0x82   : > { %s1720_s30 = scalar_lea.vmem %s272_s20, 128  ;;  %s1900_s15 = smov [#allocation3]  }
  0x83   : > { %p1721_p9 = scmp.ne.s32.totalorder %s272_s20, %s1720_s30  ;;  %s1725_s8 = sshll.u32 %s1900_s15, 4  ;;  %s1726_s8 = int_to_ptr.vmem [resolvable:$false] %s1725_s8 }
  0x84   : > { %s1727_s4 = scalar_lea.vmem %s1726_s8, 256  ;;  %p1728_p10 = scmp.lt.s32.totalorder %s272_s20, %s1726_s8 }
  0x85   : > { %p1723_p2 = pnand %p1721_p9, %p2395_p7  ;;  %p1729_p3 = scmp.lt.s32.totalorder %s1727_s4, %s1720_s30 }
  0x87   : > { %p1724_p4 = pneg %p1723_p2  ;;  %p1730_p11 = por %p1729_p3, %p1728_p10 }
  0x89   : > { %p1731_p6 = pnand %p1730_p11, %p1724_p4 }
  0x8b   : > { %1734 = shalt.err (!%p1731_p6)
}
  0x8c   : > { %p2396_p13 = scmp.ne.s32.totalorder %s2389_s19, 0  ;;  %s2156_s1 = scalar_lea.hbm %s2354_s2, %s2056_s17 }
  0x8d   : > { %s300_s21 = scalar_lea.vmem [#allocation8], %s2053_s9  ;;  %s1735_s30 = scalar_lea.hbm %s2156_s1, 128 }
  0x8e   : > { %1522 = dma.hbm_to_vmem [thread:$0]  (!%p2396_p13), %s2131_s28, 128, %s272_s20, %s260_s10  }
  0x8f   : > { %s307_s12 = sshll.u32 %s300_s21, 4  ;;  %p1736_p1 = scmp.ne.s32.totalorder %s2156_s1, %s1735_s30  ;;  %s308_s12 = int_to_ptr.vmem [resolvable:$true] %s307_s12 }
  0x90   : > { %s1740_s28 = scalar_lea.hbm %s2354_s2, 256  ;;  %p1741_p0 = scmp.lt.u32.totalorder %s2156_s1, %s2354_s2 }
  0x91   : > { %p1738_p8 = pnand %p1736_p1, %p2395_p7  ;;  %p1742_p5 = scmp.lt.u32.totalorder %s1740_s28, %s1735_s30 }
  0x92   : > { %p1744_p2 = scmp.lt.u32.totalorder %s1735_s30, %s2156_s1 }
  0x93   : > { %p1739_p12 = pneg %p1738_p8  ;;  %p1743_p9 = por %p1742_p5, %p1741_p0 }
  0x95   : > { %p1745_p4 = por %p1744_p2, %p1743_p9 }
  0x97   : > { %p1746_p10 = pnand %p1745_p4, %p1739_p12 }
  0x99   : > { %1749 = shalt.err (!%p1746_p10)
}
  0x9a   : > { %s1750_s9 = scalar_lea.vmem %s308_s12, 128  ;;  %s1901_s17 = smov [#allocation8]  }
  0x9b   : > { %p1751_p3 = scmp.ne.s32.totalorder %s308_s12, %s1750_s9  ;;  %s1755_s4 = sshll.u32 %s1901_s17, 4  ;;  %s1756_s4 = int_to_ptr.vmem [resolvable:$false] %s1755_s4 }
  0x9c   : > { %s1757_s23 = scalar_lea.vmem %s1756_s4, 256  ;;  %p1758_p1 = scmp.lt.s32.totalorder %s308_s12, %s1756_s4 }
  0x9d   : > { %p1753_p11 = pnand %p1751_p3, %p2395_p7  ;;  %p1759_p8 = scmp.lt.s32.totalorder %s1757_s23, %s1750_s9 }
  0x9f   : > { %p1754_p6 = pneg %p1753_p11  ;;  %p1760_p13 = por %p1759_p8, %p1758_p1 }
  0xa1   : > { %p1761_p0 = pnand %p1760_p13, %p1754_p6 }
  0xa3   : > { %1764 = shalt.err (!%p1761_p0)
}
  0xa4   : > { %p2397_p5 = scmp.ne.s32.totalorder %s2389_s19, 0  ;;  %s1389_s11 = sshll.u32 %s1889_s25, 4 }
  0xa5   : > { %s317_s21 = scalar_lea.vmem [#allocation9], %s2050_s16  ;;  %s2182_s28 = scalar_lea.hbm %s2355_s3, %s1389_s11 }
  0xa6   : > { %1528 = dma.hbm_to_vmem [thread:$0]  (!%p2397_p5), %s2156_s1, 128, %s308_s12, %s2077_s13  }
  0xa7   : > { %s324_s30 = sshll.u32 %s317_s21, 4  ;;  %s2398_s20 = sand.u32 1, %s1893_s26   ;;  %s325_s30 = int_to_ptr.vmem [resolvable:$true] %s324_s30 }
  0xa8   : > { %s315_s10 = scalar_lea.sflag [#allocation10], %s2398_s20  ;;  %s1765_s9 = scalar_lea.hbm %s2182_s28, 16 }
  0xa9   : > { %p1766_p13 = scmp.ne.s32.totalorder %s2182_s28, %s1765_s9  ;;  %s1770_s1 = scalar_lea.hbm %s2355_s3, 32 }
  0xaa   : > { %p1771_p2 = scmp.lt.u32.totalorder %s2182_s28, %s2355_s3  ;;  %p1772_p4 = scmp.lt.u32.totalorder %s1770_s1, %s1765_s9 }
  0xab   : > { %p1768_p12 = pnand %p1766_p13, %p2395_p7  ;;  %p1774_p3 = scmp.lt.u32.totalorder %s1765_s9, %s2182_s28 }
  0xac   : > { %p1773_p10 = por %p1772_p4, %p1771_p2 }
  0xad   : > { %p1769_p9 = pneg %p1768_p12 }
  0xae   : > { %p1775_p11 = por %p1774_p3, %p1773_p10 }
  0xb0   : > { %p1776_p6 = pnand %p1775_p11, %p1769_p9 }
  0xb2   : > { %1779 = shalt.err (!%p1776_p6)
}
  0xb3   : > { %s1780_s4 = scalar_lea.vmem %s325_s30, 16  ;;  %s1902_s23 = smov [#allocation9]  }
  0xb4   : > { %p1781_p1 = scmp.ne.s32.totalorder %s325_s30, %s1780_s4  ;;  %s1785_s11 = sshll.u32 %s1902_s23, 4  ;;  %s1786_s11 = int_to_ptr.vmem [resolvable:$false] %s1785_s11 }
  0xb5   : > { %s1787_s21 = scalar_lea.vmem %s1786_s11, 32  ;;  %p1788_p13 = scmp.lt.s32.totalorder %s325_s30, %s1786_s11 }
  0xb6   : > { %p1783_p8 = pnand %p1781_p1, %p2395_p7  ;;  %p1789_p12 = scmp.lt.s32.totalorder %s1787_s21, %s1780_s4 }
  0xb8   : > { %p1784_p0 = pneg %p1783_p8  ;;  %p1790_p5 = por %p1789_p12, %p1788_p13 }
  0xba   : > { %p1791_p2 = pnand %p1790_p5, %p1784_p0 }
  0xbc   : > { %1794 = shalt.err (!%p1791_p2)
}
  0xbd   : > { %p2399_p4 = scmp.ne.s32.totalorder %s2389_s19, 0  ;;  %p2400_p9 = scmp.ne.s32.totalorder %s2382_s7, 0 }
  0xbe   : > { %s2206_s18 = sand.u32 (!%p2400_p9), 1, %s1877_s22   ;;  %p2401_p7 = scmp.ne.s32.totalorder (!%p2400_p9), %s2379_s29, 0 }
  0xbf   : > { %1531 = dma.hbm_to_vmem [thread:$0]  (!%p2399_p4), %s2182_s28, 16, %s325_s30, %s315_s10  }
  0xc0   : > { %333 = sbr.rel (%p2400_p9) target bundleno = 1283 (0x503), region = 44  ;;  %s2209_s15 = sshll.u32 (!%p2400_p9), %s2206_s18, 3 }
  0xc1   : > { %s336_s8 = scalar_lea.sflag (!%p2400_p9), [#allocation4], %s2206_s18  ;;  %s339_s20 = scalar_lea.vmem (!%p2400_p9), [#allocation3], %s2209_s15 }
  0xc7   : > { %1848 = dma.done.wait (%p2401_p7), %s336_s8, 128  }
  0xc8   : > { %1850 = vsyncadd (%p2401_p7), %s336_s8, 4294967168  ;;  %s344_s7 = sand.u32 1, %s1979_s27   ;;  %s348_s30 = scalar_lea.vmem [#allocation6], %s2209_s15 }
  0xc9   : > { %s345_s19 = scalar_lea.sflag [#allocation7], %s344_s7 }
  0xca   : > { %1852 = dma.done.wait (%p2401_p7), %s345_s19, 256  }
  0xcb   : > { %1854 = vsyncadd (%p2401_p7), %s345_s19, 4294967040  ;;  %s357_s28 = scalar_lea.vmem [#allocation8], %s2209_s15  ;;  %s363_s10 = scalar_lea.sflag [#allocation10], %s344_s7 }
  0xcc   : > { %s365_s9 = scalar_lea.vmem [#allocation9], %s2206_s18 }
  0xcd   : > { %1856 = dma.done.wait (%p2401_p7), %s363_s10, 16  }
  0xce   : > { %1858 = vsyncadd (%p2401_p7), %s363_s10, 4294967280  ;;  %p2402_p5 = scmp.eq.s32.totalorder %s1979_s27, 0 }
  0xd0   : > { %1860 = dma.done.wait (%p2402_p5), [#allocation10], 512   ;;  %p2403_p10 = pmov %p2402_p5 }
  0xd1   : > { %p2404_p3 = pmov %p2402_p5 }
  0xd2   : > { %1862 = vsyncadd (%p2403_p10), [#allocation10], 4294966784 }
  0xd3   : > { %1864 = dma.done.wait (%p2404_p3), [#allocation13], 16   ;;  %p2405_p11 = pmov %p2404_p3 }
  0xd4   : > { %v1903_v0 = vmov 0.0|0.0   ;;  %vm1904_vm0 = vmmov 0   ;;  %v1905_v1 = vmov 0.0   ;;  %v417_v2 = vld [vmem:[#allocation11] sm:$0xff]  ;;  %v418_v3 = vld [vmem:[#allocation11 + $0x8] sm:$0xff]  ;;  %v419_v4 = vld [vmem:[#allocation11 + $0x10] sm:$0xff] }
  0xd5   : > { %1866 = vsyncadd (%p2405_p11), [#allocation13], 4294967280  ;;  %1488 = vmatprep.subr.bf16.mxu0 %v1903_v0  ;;  %1445 = vmatprep.mubr.msk.f32.mxu0 %vm1904_vm0, %v1905_v1  ;;  %v1489_v5 = vpack.c.bf16 %v418_v3, %v417_v2  ;;  %v420_v6 = vld [vmem:[#allocation11 + $0x18] sm:$0xff]  ;;  %s1906_s27 = smov 112   ;;  %s1907_s29 = smov 120   ;;  %vm428_vm1 = vcmask 261120  }
  0xd6   : > { %1448 = vmatprep.subr.mxu1 %v1905_v1  ;;  %1450 = vmatprep.mubr.msk.f32.mxu1 %vm1904_vm0, %v1905_v1  ;;  %v848_v7 = vld [vmem:[%s348_s30] sm:$0xff]  ;;  %v1492_v8 = vpack.c.bf16 %v420_v6, %v419_v4  ;;  %v416_v9 = vld [vmem:[%s339_s20] sm:$0xff]  ;;  %vm511_vm2 = vcmask 64512   ;;  %s1908_s13 = smov 104   ;;  %s1909_s16 = smov 8   ;;  %vm846_vm3 = vcmask 130112  }
  0xd7   : > { %853 = vrot.lane.b32.xlu1 %v848_v7, %s1906_s27  ;;  %678 = vrot.lane.b32.xlu0 %v848_v7, %s1907_s29  ;;  %v1397_v11 = vld [vmem:[#allocation12] ss:$0 sm:$0xff]  ;;  %v674_v15 = vld [vmem:[%s357_s28] sm:$0xff]  ;;  %v1399_v21 = vld [vmem:[%s365_s9] ss:$0 sm:$0xff]  ;;  %s1910_s1 = smov 16  }
  0xd8   : > { %1490 = vmatpush3.bf16.msra.mxu0 %v1489_v5  ;;  %1449 = vmatpush3.xpose.msk.msra.mxu1 %vm511_vm2, %v848_v7  ;;  %s1911_s12 = smov 24   ;;  %vm1021_vm4 = vcmask 195712   ;;  %vm1196_vm5 = vcmask 261312   ;;  %s1413_s17 = sshll.u32 %s1885_s24, 7 }
  0xd9   : > { %1491 = vmatprep.subr.bf16.mxu0 %v1903_v0  ;;  %1453 = vmatprep.subr.mxu1 %v1905_v1  ;;  %s415_s4 = scalar_lea.vmem [#allocation14], %s2209_s15  ;;  %s2302_s8 = scalar_lea.hbm %s2358_s6, %s1413_s17 }
  0xda   : > { %s1215_s23 = sshll.u32 %s415_s4, 4  ;;  %s1201_s20 = scalar_lea.sflag [#allocation5], %s2206_s18  ;;  %s2304_s23 = int_to_ptr.vmem [resolvable:$true] %s1215_s23 }
  0xdb   : > { %s1795_s7 = scalar_lea.vmem %s2304_s23, 128  ;;  %p2406_p1 = scmp.ne.s32.totalorder %s2387_s14, 0 }
  0xdc   : > { %1493 = vmatpush3.bf16.msra.mxu0 %v1492_v8  ;;  %p1796_p6 = scmp.ne.s32.totalorder %s2304_s23, %s1795_s7  ;;  %s1912_s24 = smov [#allocation14]  }
  0xdd   : > { %1458 = vmatprep.subr.mxu0 %v1905_v1  ;;  %s1799_s15 = sshll.u32 %s1912_s24, 4  ;;  %s1800_s15 = int_to_ptr.vmem [resolvable:$false] %s1799_s15 }
  0xde   : > { %p1797_p8 = pnand %p1796_p6, %p2406_p1  ;;  %s1801_s19 = scalar_lea.vmem %s1800_s15, 256 }
  0xdf   : > { %1446 = vmatmul.mubr.msk.f32.vlgmr.msra.gmra.mrb[0].mxu0 %vm428_vm1, %v416_v9  ;;  %p1802_p13 = scmp.lt.s32.totalorder %s2304_s23, %s1800_s15  ;;  %p1803_p12 = scmp.lt.s32.totalorder %s1801_s19, %s1795_s7 }
  0xe0   : > { %1460 = vmatprep.mubr.msk.f32.mxu0 %vm1904_vm0, %v1905_v1  ;;  %p1798_p0 = pneg %p1797_p8 }
  0xe1   : > { %p1804_p2 = por %p1803_p12, %p1802_p13 }
  0xe3   : > { %p1805_p4 = pnand %p1804_p2, %p1798_p0 }
 0x149   : > { %v679_v10 = vpop.permute.xlu0 %678  ;;  %v854_v16 = vpop.permute.xlu1 %853 }
 0x14a   : > { %1459 = vmatpush3.xpose.msk.msra.mxu0 %vm511_vm2, %v679_v10 }
 0x14b   : > { %1468 = vmatprep.subr.mxu0 %v1905_v1 }
 0x1b2   : > { %v498_v12 = vpop.f32.mrb[0].mxu0 }
 0x1b3   : > { %v499_v13 = vadd.f32 %v1397_v11, %v498_v12  ;;  %v1447_v14 = vpop.f32.mrb[1].mxu0 }
 0x1b5   : > { %850 = vrot.lane.b32.xlu1 %v499_v13, %s1906_s27  ;;  %675 = vrot.lane.b32.xlu0 %v499_v13, %s1907_s29 }
 0x1b6   : > { %1451 = vmatmul.mubr.msk.f32.vlgmr.msra.gmra.mrb[0].mxu1 %vm511_vm2, %v499_v13 }
 0x1b7   : > { %1455 = vmatprep.mubr.msk.f32.mxu1 %vm1904_vm0, %v1905_v1  ;;  %1454 = vmatpush3.msra.mxu1 %v674_v15 }
 0x1b8   : > { %1463 = vmatprep.subr.mxu1 %v1905_v1 }
 0x1b9   : > { %1025 = vrot.lane.b32.xlu1 %v499_v13, %s1908_s13  ;;  %1028 = vrot.lane.b32.xlu0 %v848_v7, %s1908_s13 }
 0x1bd   : > { %765 = vrot.lane.b32.xlu1 %v674_v15, %s1907_s29 }
 0x227   : > { %v676_v17 = vpop.permute.xlu0 %675  ;;  %v851_v18 = vpop.permute.xlu1 %850 }
 0x228   : > { %1461 = vmatmul.mubr.msk.f32.vlgmr.msra.gmra.mrb[2].mxu0 %vm511_vm2, %v676_v17 }
 0x229   : > { %1469 = vmatpush3.xpose.msk.msra.mxu0 %vm511_vm2, %v854_v16  ;;  %1470 = vmatprep.mubr.msk.f32.mxu0 %vm1904_vm0, %v1905_v1 }
 0x22a   : > { %1478 = vmatprep.subr.mxu0 %v1905_v1 }
 0x22b   : > { %v1029_v19 = vpop.permute.xlu0 %1028  ;;  %v1026_v20 = vpop.permute.xlu1 %1025 }
 0x22c   : > { %1471 = vmatmul.mubr.msk.f32.vlgmr.msra.gmra.mrb[4].mxu0 %vm511_vm2, %v851_v18 }
 0x22d   : > { %1479 = vmatpush3.xpose.msk.msra.mxu0 %vm511_vm2, %v1029_v19  ;;  %1480 = vmatprep.mubr.msk.f32.mxu0 %vm1904_vm0, %v1905_v1 }
 0x22f   : > { %v766_v41 = vpop.permute.xlu1 %765 }
 0x230   : > { %1481 = vmatmul.mubr.msk.f32.vlgmr.msra.gmra.mrb[6].mxu0 %vm511_vm2, %v1026_v20 }
 0x289   : > { %v584_v22 = vpop.f32.mrb[0].mxu1 }
 0x28a   : > { %v585_v23 = vadd.f32 %v1399_v21, %v584_v22  ;;  %v1452_v24 = vpop.f32.mrb[1].mxu1 }
 0x28c   : > { %v588_v25 = vsel %vm511_vm2, %v585_v23, -inf }
 0x28d   : > { %589 = vmax.xlane.f32.xlu0 %v588_v25 }
 0x2fb   : > { %v750_v26 = vpop.f32.mrb[2].mxu0 }
 0x2fc   : > { %v751_v27 = vadd.f32 %v1399_v21, %v750_v26  ;;  %v1462_v28 = vpop.f32.mrb[3].mxu0 }
 0x2fe   : > { %v754_v29 = vsel %vm511_vm2, %v751_v27, -inf }
 0x2ff   : > { %755 = vmax.xlane.f32.xlu1 %v754_v29  ;;  %v925_v30 = vpop.f32.mrb[4].mxu0 }
 0x300   : > { %v926_v31 = vadd.f32 %v1399_v21, %v925_v30  ;;  %v1472_v32 = vpop.f32.mrb[5].mxu0 }
 0x302   : > { %v929_v33 = vsel %vm511_vm2, %v926_v31, -inf }
 0x303   : > { %930 = vmax.xlane.f32.xlu0 %v929_v33  ;;  %v1100_v34 = vpop.f32.mrb[6].mxu0 }
 0x304   : > { %v1101_v35 = vadd.f32 %v1399_v21, %v1100_v34  ;;  %v1482_v36 = vpop.f32.mrb[7].mxu0 }
 0x306   : > { %v1104_v37 = vsel %vm511_vm2, %v1101_v35, -inf }
 0x307   : > { %1105 = vmax.xlane.f32.xlu0 %v1104_v37 }
 0x310   : > { %1115 = vrot.lane.b32.xlu1 %v674_v15, %s1908_s13 }
 0x31a   : > { %v590_v38 = vpop.xlane.xlu0 %589 }
 0x31b   : > { %v591_v39 = vsub.f32 %v585_v23, %v590_v38 }
 0x31d   : > { %v592_v40 = vmul.f32 1.442695, %v591_v39  ;;  %940 = vrot.lane.b32.xlu0 %v674_v15, %s1906_s27 }
 0x31f   : > { %1603 = vpow2.f32 %v592_v40 }
 0x329   : > { %v1604_v42 = vpop.eup %1603 }
 0x32a   : > { %1456 = vmatmul.mubr.msk.f32.vlgmr.msra.gmra.mrb[2].mxu1 %vm511_vm2, %v1604_v42  ;;  %v594_v57 = vsel %vm511_vm2, %v1604_v42, 0.0 }
 0x32b   : > { %1464 = vmatpush3.msra.mxu1 %v766_v41  ;;  %1465 = vmatprep.mubr.msk.f32.mxu1 %vm1904_vm0, %v1905_v1 }
 0x32c   : > { %1473 = vmatprep.subr.mxu1 %v1905_v1 }
 0x38c   : > { %v756_v43 = vpop.xlane.xlu1 %755 }
 0x38d   : > { %v757_v44 = vsub.f32 %v751_v27, %v756_v43 }
 0x38f   : > { %v758_v45 = vmul.f32 1.442695, %v757_v44 }
 0x390   : > { %v931_v46 = vpop.xlane.xlu0 %930  ;;  %v1116_v55 = vpop.permute.xlu1 %1115 }
 0x391   : > { %1605 = vpow2.f32 %v758_v45  ;;  %v932_v47 = vsub.f32 %v926_v31, %v931_v46 }
 0x393   : > { %v933_v48 = vmul.f32 1.442695, %v932_v47 }
 0x394   : > { %v1106_v49 = vpop.xlane.xlu0 %1105 }
 0x395   : > { %1607 = vpow2.f32 %v933_v48  ;;  %v1107_v50 = vsub.f32 %v1101_v35, %v1106_v49 }
 0x397   : > { %v1108_v51 = vmul.f32 1.442695, %v1107_v50 }
 0x398   : > { %v941_v52 = vpop.permute.xlu0 %940 }
 0x399   : > { %1609 = vpow2.f32 %v1108_v51 }
 0x39b   : > { %v1606_v53 = vpop.eup %1605 }
 0x39c   : > { %1466 = vmatmul.mubr.msk.f32.vlgmr.msra.gmra.mrb[4].mxu1 %vm511_vm2, %v1606_v53  ;;  %v760_v54 = vsel %vm511_vm2, %v1606_v53, 0.0 }
 0x39d   : > { %1474 = vmatpush3.msra.mxu1 %v941_v52  ;;  %761 = vadd.xlane.f32.xlu1 %v760_v54 }
 0x39e   : > { %1475 = vmatprep.mubr.msk.f32.mxu1 %vm1904_vm0, %v1905_v1  ;;  %1483 = vmatprep.subr.mxu1 %v1905_v1 }
 0x39f   : > { %v1608_v56 = vpop.eup %1607 }
 0x3a0   : > { %1476 = vmatmul.mubr.msk.f32.vlgmr.msra.gmra.mrb[6].mxu1 %vm511_vm2, %v1608_v56  ;;  %v935_v58 = vsel %vm511_vm2, %v1608_v56, 0.0 }
 0x3a1   : > { %1484 = vmatpush3.msra.mxu1 %v1116_v55  ;;  %595 = vadd.xlane.f32.xlu1 %v594_v57 }
 0x3a2   : > { %936 = vadd.xlane.f32.xlu0 %v935_v58  ;;  %1485 = vmatprep.mubr.msk.f32.mxu1 %vm1904_vm0, %v1905_v1 }
 0x3a3   : > { %v1610_v59 = vpop.eup %1609 }
 0x3a4   : > { %1486 = vmatmul.mubr.msk.f32.vlgmr.msra.gmra.mrb[8].mxu1 %vm511_vm2, %v1610_v59  ;;  %v1110_v60 = vsel %vm511_vm2, %v1610_v59, 0.0 }
 0x3a6   : > { %1111 = vadd.xlane.f32.xlu0 %v1110_v60 }
 0x3fd   : > { %v667_v61 = vpop.f32.mrb[2].mxu1 }
 0x3fe   : > { %v1457_v62 = vpop.f32.mrb[3].mxu1 }
 0x42a   : > { %v762_v63 = vpop.xlane.xlu1 %761 }
 0x42e   : > { %v596_v0 = vpop.xlane.xlu1 %595 }
 0x42f   : > { %1611 = vrcp.f32 %v596_v0  ;;  %v937_v4 = vpop.xlane.xlu0 %936 }
 0x430   : > { %1613 = vrcp.f32 %v762_v63 }
 0x431   : > { %1615 = vrcp.f32 %v937_v4 }
 0x433   : > { %v1112_v5 = vpop.xlane.xlu0 %1111 }
 0x434   : > { %1617 = vrcp.f32 %v1112_v5 }
 0x439   : > { %v1612_v2 = vpop.eup %1611 }
 0x43a   : > { %v671_v3 = vmul.f32 %v1612_v2, %v667_v61  ;;  %v1614_v1 = vpop.eup %1613 }
 0x43b   : > { %v1616_v9 = vpop.eup %1615 }
 0x43c   : > { %672 = vst.msk [vmem:[#allocation2] sm:$0xff] %vm511_vm2, %v671_v3 }
 0x43e   : > { %v1618_v13 = vpop.eup %1617 }
 0x46f   : > { %v837_v6 = vpop.f32.mrb[4].mxu1 }
 0x470   : > { %v841_v7 = vmul.f32 %v1614_v1, %v837_v6  ;;  %v1467_v8 = vpop.f32.mrb[5].mxu1 }
 0x472   : > { %843 = vrot.lane.b32.xlu0 %v841_v7, %s1909_s16 }
 0x473   : > { %v1012_v10 = vpop.f32.mrb[6].mxu1 }
 0x474   : > { %v1016_v11 = vmul.f32 %v1616_v9, %v1012_v10  ;;  %v1477_v12 = vpop.f32.mrb[7].mxu1 }
 0x476   : > { %1018 = vrot.lane.b32.xlu1 %v1016_v11, %s1910_s1 }
 0x477   : > { %v1187_v14 = vpop.f32.mrb[8].mxu1 }
 0x478   : > { %v1191_v15 = vmul.f32 %v1618_v13, %v1187_v14  ;;  %v1487_v16 = vpop.f32.mrb[9].mxu1 }
 0x47a   : > { %1193 = vrot.lane.b32.xlu1 %v1191_v15, %s1911_s12 }
 0x4e4   : > { %v844_v17 = vpop.permute.xlu0 %843 }
 0x4e5   : > { %847 = vst.msk [vmem:[#allocation2] sm:$0xff] %vm846_vm3, %v844_v17 }
 0x4e8   : > { %v1019_v18 = vpop.permute.xlu1 %1018 }
 0x4e9   : > { %1022 = vst.msk [vmem:[#allocation2] sm:$0xff] %vm1021_vm4, %v1019_v18 }
 0x4ec   : > { %v1194_v19 = vpop.permute.xlu1 %1193 }
 0x4ed   : > { %1197 = vst.msk [vmem:[#allocation2] sm:$0xff] %vm1196_vm5, %v1194_v19 }
 0x4f4   : > { %v1198_v20 = vld [vmem:[#allocation2] sm:$0xff] }
 0x4f5   : > { %1199 = vst.msk [vmem:[%s415_s4] sm:$0xff] %vm428_vm1, %v1198_v20 }
 0x4f6   : > { %1808 = shalt.err (!%p1805_p4)
}
 0x4f7   : > { %s1809_s18 = scalar_lea.hbm %s2302_s8, 128  ;;  %s1813_s10 = scalar_lea.hbm %s2358_s6, 256 }
 0x4f8   : > { %p1810_p9 = scmp.ne.s32.totalorder %s2302_s8, %s1809_s18  ;;  %p1814_p10 = scmp.lt.u32.totalorder %s2302_s8, %s2358_s6 }
 0x4f9   : > { %p1815_p3 = scmp.lt.u32.totalorder %s1813_s10, %s1809_s18  ;;  %p1817_p6 = scmp.lt.u32.totalorder %s1809_s18, %s2302_s8 }
 0x4fa   : > { %p1811_p7 = pnand %p1810_p9, %p2406_p1 }
 0x4fb   : > { %p1816_p11 = por %p1815_p3, %p1814_p10 }
 0x4fc   : > { %p1812_p5 = pneg %p1811_p7 }
 0x4fd   : > { %p1818_p8 = por %p1817_p6, %p1816_p11 }
 0x4ff   : > { %p1819_p0 = pnand %p1818_p8, %p1812_p5 }
 0x501   : > { %1822 = shalt.err (!%p1819_p0)
}
 0x502   : > { %1510 = dma.vmem_to_hbm [thread:$0]  (%p2406_p1), %s2304_s23, 128, %s2302_s8, %s1201_s20  }
 0x503 PF: > { %s2407_s29 = sld [smem:[#allocation21_spill]]  ;;  %s2408_s13 = sld [smem:[#allocation23_spill]] }
 0x504   : > { %p2410_p12 = scmp.ge.s32.totalorder %s1893_s26, 2 }
 0x509   : > { %s1227_s16 = sand.u32 1, %s2407_s29   ;;  %p2409_p13 = scmp.ne.s32.totalorder %s2408_s13, 0 }
 0x50a   : > { %s1228_s1 = scalar_lea.sflag [#allocation5], %s1227_s16 }
 0x50b   : > { %p1533_p2 = pnand %p2410_p12, %p2409_p13 }
 0x50d   : > { %1868 = dma.done.wait (!%p1533_p2), %s1228_s1, 128  }
 0x50e   : > { %1870 = vsyncadd (!%p1533_p2), %s1228_s1, 4294967168  ;;  %s29_s26 = sadd.s32 1, %s1893_s26   ;;  %s2411_s12 = sld [smem:[#allocation22_spill]] }
 0x50f   : > { %p26_p4 = scmp.ge.s32.totalorder %s29_s26, 4   ;;  %s2412_s23 = sld [smem:[#allocation25_spill]] }
 0x510   : > { %s2413_s14 = sld [smem:[#allocation24_spill]]  ;;  %s2414_s21 = smov %s1877_s22 }
 0x511   : > { %s2416_s24 = smov %s1889_s25  ;;  %28 = sbr.rel (!%p26_p4) target bundleno = 14 (0xe), region = 134 }
 0x514   : > { %s2415_s22 = smov %s2411_s12 }
 0x516   : > { %s2417_s25 = smov %s2413_s14 }
 0x518   :  { %1233 = vsyncpa [#allocation4], 1 }
 0x519   :  { %1235 = vsyncpa [#allocation4 + $0x1], 1 }
 0x51a   :  { %1236 = vsyncpa [#allocation7], 1 }
 0x51b   :  { %1238 = vsyncpa [#allocation7 + $0x1], 1 }
 0x51c   :  { %1239 = vsyncpa [#allocation10], 1 }
 0x51d   :  { %1241 = vsyncpa [#allocation10 + $0x1], 1 }
 0x51e   :  { %1242 = vsyncpa [#allocation13], 1 }
 0x51f   :  { %1243 = vsyncpa [#allocation5], 1 }
 0x520   :  { %1245 = vsyncpa [#allocation5 + $0x1], 1 }

</bundles_post_ra>
